<compile_context>
chip_gen: v7x
topology: tpu7x:2x2x1
jax: 0.10.0
libtpu: 0.0.40
codegen_flags: <defaults>
</compile_context>

<pallas_src>
import math
import jax
import jax.numpy as jnp
from jax.experimental import pallas as pl
from jax.experimental.pallas import tpu as pltpu

B, T = 2, 8
N_CHANNELS = 4
MULT = 2
INPUT_DIM = N_CHANNELS * MULT            # 8
HIDDEN = 32
MAX_F = 16
SCALE = float(math.sqrt(HIDDEN))         # config.scale == None -> hidden**0.5
BT = B * T                               # flattened batch*time rows (matmul M dim)

# Packed parameter slab: (SLAB_ROWS, HIDDEN) f32.  All sections start on 8-row
# boundaries and are used at full lane width (zero padding is mathematically inert).
ROW_W1 = 0    # rows 0..3  : w1  (N_CHANNELS, INPUT_DIM) in cols [0:INPUT_DIM]
ROW_B1 = 8    # row  8     : b1  in cols [0:INPUT_DIM]
ROW_W2 = 16   # rows 16..23: w2  (INPUT_DIM, HIDDEN); rows 24..47 zero
ROW_B2 = 48   # row  48    : b2  (HIDDEN,)
ROW_POS = 56  # rows 56..71: pos (MAX_F, HIDDEN)
SLAB_ROWS = 72


def _embed_kernel(x_ref, ts_ref, slab_ref, out_ref):
    """Fused: embed_spikes (Linear) -> gelu*scale -> projection (Linear) + pos_embed.

    x_ref   : (BT, N_CHANNELS) f32   spikes, flattened over (batch, time)
    ts_ref  : (BT, 1)          int32 timestamps
    slab_ref: (SLAB_ROWS, HIDDEN) f32 packed parameters (layout above)
    out_ref : (BT, HIDDEN)     f32
    """
    x = x_ref[...]                                             # (BT, C)

    w1 = slab_ref[ROW_W1:ROW_W1 + N_CHANNELS, :]               # (C, H), cols>=INPUT_DIM are 0
    b1 = slab_ref[ROW_B1:ROW_B1 + 1, :]                        # (1, H), cols>=INPUT_DIM are 0
    w2 = slab_ref[ROW_W2:ROW_W2 + HIDDEN, :]                   # (H, H), rows>=INPUT_DIM are 0
    b2 = slab_ref[ROW_B2:ROW_B2 + 1, :]                        # (1, H)
    pos = slab_ref[ROW_POS:ROW_POS + MAX_F, :]                 # (MAX_F, H)

    # x = self.embed_spikes(spikes); lanes >= INPUT_DIM stay exactly 0.
    h = jnp.dot(x, w1, preferred_element_type=jnp.float32) + b1            # (BT, H)

    # x = self.act(x) * self.scale — whole tile; gelu(0)*scale == 0 on the pad lanes.
    h = jax.nn.gelu(h, approximate=True) * SCALE

    # In-kernel one-hot(timestamp); out-of-range timestamps give a zero pos-embedding
    # (nn.Embedding would raise — inputs are assumed in [0, MAX_F)).
    ts = ts_ref[...]                                                        # (BT, 1)
    lane = jax.lax.broadcasted_iota(jnp.int32, (x.shape[0], MAX_F), 1)      # (BT, MAX_F)
    onehot = (lane == ts).astype(jnp.float32)

    # x = self.projection(x) + self.embed_pos(timestamp)
    out_ref[...] = (jnp.dot(h, w2, preferred_element_type=jnp.float32)
                    + jnp.dot(onehot, pos, preferred_element_type=jnp.float32)
                    + b2)


def pack_params(params):
    """One-time layout prep: pack all 5 parameter tensors into one (72, 32) slab."""
    slab = jnp.zeros((SLAB_ROWS, HIDDEN), jnp.float32)
    slab = slab.at[ROW_W1:ROW_W1 + N_CHANNELS, 0:INPUT_DIM].set(params["w1"])
    slab = slab.at[ROW_B1, 0:INPUT_DIM].set(params["b1"].reshape(INPUT_DIM))
    slab = slab.at[ROW_W2:ROW_W2 + INPUT_DIM, :].set(params["w2"])
    slab = slab.at[ROW_B2, :].set(params["b2"].reshape(HIDDEN))
    slab = slab.at[ROW_POS:ROW_POS + MAX_F, :].set(params["pos"])
    return slab


def neural_embedding_forward(spikes, spikes_mask, spikes_timestamp, param_slab):
    """Forward pass. `param_slab` = pack_params(params), prepared once."""
    Bn, Tn, C = spikes.shape

    # Wrapper does metadata-only work: flatten (B,T) -> rows, reshape timestamps.
    x2d = spikes.reshape(Bn * Tn, C)
    ts2d = spikes_timestamp.reshape(Bn * Tn, 1).astype(jnp.int32)

    out2d = pl.pallas_call(
        _embed_kernel,
        out_shape=jax.ShapeDtypeStruct((Bn * Tn, HIDDEN), jnp.float32),
        # Single grid-less invocation; explicit full-array VMEM blocks.
        in_specs=[
            pl.BlockSpec(memory_space=pltpu.MemorySpace.VMEM),   # spikes
            pl.BlockSpec(memory_space=pltpu.MemorySpace.VMEM),   # timestamps
            pl.BlockSpec(memory_space=pltpu.MemorySpace.VMEM),   # param slab
        ],
        out_specs=pl.BlockSpec(memory_space=pltpu.MemorySpace.VMEM),
    )(x2d, ts2d, param_slab)

    # dropout in eval mode == identity; non-stack path returns mask/timestamps unchanged.
    return out2d.reshape(Bn, Tn, HIDDEN), spikes_mask, spikes_timestamp


def _reference(spikes, spikes_timestamp, params):
    h = spikes @ params["w1"] + params["b1"]
    h = jax.nn.gelu(h, approximate=True) * SCALE
    y = h @ params["w2"] + params["b2"]
    return y + params["pos"][spikes_timestamp]


if __name__ == "__main__":
    key = jax.random.PRNGKey(0)
    k1, k2, k3, k4, k5, k6 = jax.random.split(key, 6)

    # Deterministic synthetic parameters (shapes dictated by __init__).
    params = {
        "w1": 0.10 * jax.random.normal(k1, (N_CHANNELS, INPUT_DIM), jnp.float32),
        "b1": 0.01 * jax.random.normal(k2, (1, INPUT_DIM), jnp.float32),
        "w2": 0.10 * jax.random.normal(k3, (INPUT_DIM, HIDDEN), jnp.float32),
        "b2": 0.01 * jax.random.normal(k4, (1, HIDDEN), jnp.float32),
        "pos": 0.02 * jax.random.normal(k5, (MAX_F, HIDDEN), jnp.float32),
    }

    spikes = jax.random.normal(k6, (B, T, N_CHANNELS), jnp.float32)
    spikes_mask = jnp.ones((B, T), jnp.int32)
    spikes_timestamp = jnp.tile(jnp.arange(T, dtype=jnp.int32)[None, :], (B, 1))

    param_slab = pack_params(params)          # one-time layout prep
    fwd = jax.jit(neural_embedding_forward)

    out, mask_out, ts_out = fwd(spikes, spikes_mask, spikes_timestamp, param_slab)
    out = jax.block_until_ready(out)

    ref = _reference(spikes, spikes_timestamp, params)
    assert out.shape == (B, T, HIDDEN)
    assert jnp.allclose(out, ref, atol=1e-4, rtol=1e-4)
    assert jnp.array_equal(mask_out, spikes_mask)
    assert jnp.array_equal(ts_out, spikes_timestamp)
    print("KERNEL_OK")
</pallas_src>

<mosaic_0001>
module attributes {stable_mosaic.version = 11 : i64} {
  func.func @_embed_kernel(%arg0: memref<16x4xf32, #tpu.memory_space<vmem>>, %arg1: memref<16x1xi32, #tpu.memory_space<vmem>>, %arg2: memref<72x32xf32, #tpu.memory_space<vmem>>, %arg3: memref<16x32xf32, #tpu.memory_space<vmem>>) attributes {dimension_semantics = [], scalar_prefetch = 0 : i64, scratch_operands = 0 : i64, tpu.core_type = #tpu.core_type<tc>} {
    %c0 = arith.constant 0 : index
    %c0_0 = arith.constant 0 : index
    %0 = vector.load %arg0[%c0, %c0_0] : memref<16x4xf32, #tpu.memory_space<vmem>>, vector<16x4xf32>
    %c0_1 = arith.constant 0 : index
    %c0_2 = arith.constant 0 : index
    %1 = vector.load %arg2[%c0_1, %c0_2] : memref<72x32xf32, #tpu.memory_space<vmem>>, vector<4x32xf32>
    %c8 = arith.constant 8 : index
    %c0_3 = arith.constant 0 : index
    %2 = vector.load %arg2[%c8, %c0_3] : memref<72x32xf32, #tpu.memory_space<vmem>>, vector<1x32xf32>
    %c16 = arith.constant 16 : index
    %c0_4 = arith.constant 0 : index
    %3 = vector.load %arg2[%c16, %c0_4] : memref<72x32xf32, #tpu.memory_space<vmem>>, vector<32x32xf32>
    %c48 = arith.constant 48 : index
    %c0_5 = arith.constant 0 : index
    %4 = vector.load %arg2[%c48, %c0_5] : memref<72x32xf32, #tpu.memory_space<vmem>>, vector<1x32xf32>
    %c56 = arith.constant 56 : index
    %c0_6 = arith.constant 0 : index
    %5 = vector.load %arg2[%c56, %c0_6] : memref<72x32xf32, #tpu.memory_space<vmem>>, vector<16x32xf32>
    %cst = arith.constant dense<0.000000e+00> : vector<16x32xf32>
    %6 = tpu.matmul %0, %1, %cst {dimension_numbers = #tpu.dot_dimension_numbers<[1], [0], [0], [1], [0, 0, 1, 1], [], []>} : vector<16x4xf32>, vector<4x32xf32>, vector<16x32xf32> -> vector<16x32xf32>
    %7 = vector.broadcast %2 : vector<1x32xf32> to vector<16x32xf32>
    %8 = arith.addf %6, %7 : vector<16x32xf32>
    %9 = arith.mulf %8, %8 : vector<16x32xf32>
    %10 = arith.mulf %8, %9 : vector<16x32xf32>
    %cst_7 = arith.constant 4.471500e-02 : f32
    %11 = vector.broadcast %cst_7 : f32 to vector<16x32xf32>
    %12 = arith.mulf %11, %10 : vector<16x32xf32>
    %13 = arith.addf %8, %12 : vector<16x32xf32>
    %cst_8 = arith.constant 0.797884583 : f32
    %14 = vector.broadcast %cst_8 : f32 to vector<16x32xf32>
    %15 = arith.mulf %14, %13 : vector<16x32xf32>
    %16 = math.tanh %15 : vector<16x32xf32>
    %cst_9 = arith.constant 1.000000e+00 : f32
    %17 = vector.broadcast %cst_9 : f32 to vector<16x32xf32>
    %18 = arith.addf %17, %16 : vector<16x32xf32>
    %cst_10 = arith.constant 5.000000e-01 : f32
    %19 = vector.broadcast %cst_10 : f32 to vector<16x32xf32>
    %20 = arith.mulf %19, %18 : vector<16x32xf32>
    %21 = arith.mulf %8, %20 : vector<16x32xf32>
    %cst_11 = arith.constant 5.65685415 : f32
    %22 = vector.broadcast %cst_11 : f32 to vector<16x32xf32>
    %23 = arith.mulf %21, %22 : vector<16x32xf32>
    %c0_12 = arith.constant 0 : index
    %c0_13 = arith.constant 0 : index
    %24 = vector.load %arg1[%c0_12, %c0_13] : memref<16x1xi32, #tpu.memory_space<vmem>>, vector<16x1xi32>
    %25 = tpu.iota {dimensions = array<i32: 1>} : vector<16x16xi32>
    %26 = vector.broadcast %24 : vector<16x1xi32> to vector<16x16xi32>
    %27 = arith.cmpi eq, %25, %26 : vector<16x16xi32>
    %28 = arith.extui %27 : vector<16x16xi1> to vector<16x16xi32>
    %29 = arith.sitofp %28 : vector<16x16xi32> to vector<16x16xf32>
    %cst_14 = arith.constant dense<0.000000e+00> : vector<16x32xf32>
    %30 = tpu.matmul %23, %3, %cst_14 {dimension_numbers = #tpu.dot_dimension_numbers<[1], [0], [0], [1], [0, 0, 1, 1], [], []>} : vector<16x32xf32>, vector<32x32xf32>, vector<16x32xf32> -> vector<16x32xf32>
    %cst_15 = arith.constant dense<0.000000e+00> : vector<16x32xf32>
    %31 = tpu.matmul %29, %5, %cst_15 {dimension_numbers = #tpu.dot_dimension_numbers<[1], [0], [0], [1], [0, 0, 1, 1], [], []>} : vector<16x16xf32>, vector<16x32xf32>, vector<16x32xf32> -> vector<16x32xf32>
    %32 = arith.addf %30, %31 : vector<16x32xf32>
    %33 = vector.broadcast %4 : vector<1x32xf32> to vector<16x32xf32>
    %34 = arith.addf %32, %33 : vector<16x32xf32>
    %c0_16 = arith.constant 0 : index
    %c0_17 = arith.constant 0 : index
    %35 = vector.load %arg3[%c0_16, %c0_17] : memref<16x32xf32, #tpu.memory_space<vmem>>, vector<16x32xf32>
    tpu.vector_store %arg3[%c0_16, %c0_17], %34 {strides = array<i32>} : memref<16x32xf32, #tpu.memory_space<vmem>>, vector<16x32xf32>,
    return
  }
}

</mosaic_0001>

<bundles_post_ra>
// kernel: neural_embedding_forward.1
= control target key start
LH: loop header
LB: loop body
LE: loop exit
PB: predicated region body
PF: predicated region fallthrough
CT: control target
= control target key end

     0   :  { %vm37_vm0 = vcmask 1043456   ;;  %vm30_vm1 = vcmask 31744   ;;  %s515_s0 = inlined_call_operand.vmem [shape: f32[16,4], index: 0, kind: input, shape index: {}]   ;;  %s516_s1 = inlined_call_operand.vmem [shape: s32[16,1], index: 1, kind: input, shape index: {}]   ;;  %s517_s2 = inlined_call_operand.vmem [shape: f32[72,32], index: 2, kind: input, shape index: {}]   ;;  %s518_s3 = inlined_call_operand.hbm [shape: f32[16,32], index: 3, kind: output, shape index: {}]  }
   0x1   :  { %v17_v0 = vld [vmem:[%s517_s2] sm:$0xf]  ;;  %v16_v2 = vld [vmem:[%s515_s0 + $0x8] sm:$0xff] }
   0x2   :  { %v15_v1 = vld [vmem:[%s515_s0] sm:$0xff]  ;;  %364 = vmatprep.subr.msk.mxu0 %vm37_vm0, %v17_v0 }
   0x3   :  { %366 = vmatprep.mubr.msk.f32.mxu0 %vm30_vm1, %v15_v1  ;;  %v136_v3 = vld [vmem:[%s516_s1] sm:$0xff] }
   0x4   :  { %8 = vsyncpa [#allocation3], 0  ;;  %365 = vmatpush3.msk.msra.mxu0 %vm37_vm0, %v17_v0  ;;  %v435_v4 = vmov 0   ;;  %v137_v5 = vld [vmem:[%s516_s1 + $0x8] sm:$0xff]  ;;  %v24_v6 = vld [vmem:[%s517_s2 + $0x38] sm:$0xff]  ;;  %v138_v15 = vlaneseq  ;;  %vm152_vm2 = vcmask 130048  }
   0x5   :  { %406 = vset.pattern.permute.xlu0 %v435_v4  ;;  %367 = vmatmul.mubr.msk.f32.vlgmr.msra.gmra.mrb[0].mxu0 %vm30_vm1, %v16_v2  ;;  %v25_v7 = vld [vmem:[%s517_s2 + $0x40] sm:$0xff]  ;;  %v19_v8 = vld [vmem:[%s517_s2 + $0x10] sm:$0xff]  ;;  %v20_v10 = vld [vmem:[%s517_s2 + $0x18] sm:$0xff]  ;;  %v436_v18 = vmov 0.0   ;;  %vm234_vm5 = vcmask 261120   ;;  %s437_s9 = smov [#allocation2]  }
   0x6   :  { %141 = vperm.xlu0 %406, %v136_v3   ;;  %v387_v9 = vpack.c.bf16 %v25_v7, %v24_v6  ;;  %v21_v11 = vld [vmem:[%s517_s2 + $0x20] sm:$0xff]  ;;  %v22_v12 = vld [vmem:[%s517_s2 + $0x28] sm:$0xff]  ;;  %v391_v13 = vpack.c.bf16 %v20_v10, %v19_v8  ;;  %v139_v16 = vand.u32 127, %v138_v15  ;;  %v350_v49 = vld [vmem:[%s517_s2 + $0x30] ss:$0 sm:$0xff]  ;;  %s329_s10 = sshll.u32 %s437_s9, 4  ;;  %s330_s10 = int_to_ptr.vmem [resolvable:$true] %s329_s10 }
   0x7   :  { %v395_v14 = vpack.c.bf16 %v22_v12, %v21_v11  ;;  %v340_v22 = vld [vmem:[%s517_s2 + $0x8] ss:$0 sm:$0xff]  ;;  %s411_s11 = scalar_lea.vmem %s330_s10, 256  ;;  %p416_p1 = scmp.lt.s32.totalorder %s330_s10, %s330_s10 }
   0x8   :  { %388 = vmatprep.subr.bf16.mxu0 %v387_v9  ;;  %392 = vmatprep.subr.bf16.mxu1 %v391_v13  ;;  %p412_p0 = scmp.ne.s32.totalorder %s330_s10, %s411_s11  ;;  %p417_p2 = scmp.lt.s32.totalorder %s411_s11, %s411_s11 }
   0x9   :  { %390 = vmatpush3.bf16.msra.mxu0 %v387_v9  ;;  %394 = vmatpush3.bf16.msra.mxu1 %v391_v13 }
   0xa   :  { %144 = vperm.xlu0 %406, %v137_v5   ;;  %396 = vmatprep.subr.bf16.mxu1 %v395_v14  ;;  %p418_p3 = por %p417_p2, %p416_p1 }
   0xc   :  { %p419_p4 = pnand %p418_p3, %p412_p0 }
   0xd   :  { %398 = vmatpush3.bf16.msra.mxu1 %v395_v14 }
  0x85   :  { %v142_v17 = vpop.permute.xlu0 %141 }
  0x86   :  { %vm146_vm3 = vcmp.eq.s32.totalorder %v139_v16, %v142_v17 }
  0x87   :  { %v344_v19 = vsel %vm146_vm3, 1.0, %v436_v18 }
  0x88   :  { %373 = vmatprep.mubr.msk.f32.mxu0 %vm152_vm2, %v344_v19 }
  0x89   :  { %v145_v20 = vpop.permute.xlu0 %144 }
  0x8a   :  { %vm147_vm4 = vcmp.eq.s32.totalorder %v139_v16, %v145_v20 }
  0x8b   :  { %v345_v21 = vsel %vm147_vm4, 1.0, %v436_v18 }
  0x8c   :  { %374 = vmatmul.mubr.msk.f32.vlgmr.msra.gmra.mrb[2].mxu0 %vm152_vm2, %v345_v21 }
  0xd8   :  { %v368_v23 = vpop.f32.mrb[0].mxu0 }
  0xd9   :  { %v113_v24 = vadd.f32 %v368_v23, %v340_v22  ;;  %v107_v25 = vpop.f32.mrb[1].mxu0 }
  0xda   :  { %v108_v26 = vadd.f32 %v340_v22, %v107_v25 }
  0xdb   :  { %v117_v27 = vmul.f32 %v113_v24, %v113_v24 }
  0xdc   :  { %v116_v28 = vmul.f32 %v108_v26, %v108_v26 }
  0xdd   :  { %v119_v29 = vmul.f32 %v117_v27, %v113_v24 }
  0xde   :  { %v118_v30 = vmul.f32 %v116_v28, %v108_v26 }
  0xdf   :  { %v121_v31 = vmul.f32 0.044715, %v119_v29 }
  0xe0   :  { %v120_v32 = vmul.f32 0.044715, %v118_v30 }
  0xe1   :  { %v123_v33 = vadd.f32 %v121_v31, %v113_v24 }
  0xe2   :  { %v122_v34 = vadd.f32 %v120_v32, %v108_v26 }
  0xe3   :  { %v125_v35 = vmul.f32 0.7978846, %v123_v33 }
  0xe4   :  { %v124_v36 = vmul.f32 0.7978846, %v122_v34 }
  0xe5   :  { %407 = vtanh.f32 %v125_v35 }
  0xe6   :  { %409 = vtanh.f32 %v124_v36 }
  0xef   :  { %v408_v37 = vpop.eup %407 }
  0xf0   :  { %v410_v38 = vpop.eup %409  ;;  %v129_v39 = vadd.f32 1.0, %v408_v37 }
  0xf1   :  { %v128_v40 = vadd.f32 1.0, %v410_v38 }
  0xf2   :  { %v131_v41 = vmul.f32 0.5, %v129_v39 }
  0xf3   :  { %v130_v42 = vmul.f32 0.5, %v128_v40 }
  0xf4   :  { %v133_v43 = vmul.f32 %v131_v41, %v113_v24 }
  0xf5   :  { %v132_v44 = vmul.f32 %v130_v42, %v108_v26 }
  0xf6   :  { %v135_v46 = vmul.f32 5.656854, %v133_v43 }
  0xf7   :  { %v134_v45 = vmul.f32 5.656854, %v132_v44 }
  0xf9   :  { %384 = vmatprep.mubr.msk.f32.mxu1 %vm234_vm5, %v134_v45 }
  0xfa   :  { %385 = vmatmul.mubr.msk.f32.vlgmr.msra.gmra.mrb[0].mxu1 %vm234_vm5, %v135_v46 }
 0x15f   :  { %v375_v47 = vpop.f32.mrb[2].mxu0 }
 0x160   :  { %v225_v48 = vpop.f32.mrb[3].mxu0 }
 0x1cd   :  { %v386_v50 = vpop.f32.mrb[0].mxu1 }
 0x1ce   :  { %v313_v51 = vadd.f32 %v386_v50, %v375_v47  ;;  %v307_v52 = vpop.f32.mrb[1].mxu1 }
 0x1cf   :  { %v308_v53 = vadd.f32 %v307_v52, %v225_v48 }
 0x1d0   :  { %v321_v54 = vadd.f32 %v350_v49, %v313_v51 }
 0x1d1   :  { %v320_v55 = vadd.f32 %v350_v49, %v308_v53 }
 0x1d2   :  { %323 = vst.msk [vmem:[#allocation2 + $0x8] sm:$0xff] %vm234_vm5, %v321_v54 }
 0x1d3   :  { %322 = vst.msk [vmem:[#allocation2] sm:$0xff] %vm234_vm5, %v320_v55 }
 0x1d4   :  { %422 = shalt.err (!%p419_p4)
}
 0x1d5   :  { %s423_s13 = scalar_lea.hbm %s518_s3, 256 }
 0x1d6   :  { %p424_p5 = scmp.ne.s32.totalorder %s518_s3, %s423_s13  ;;  %p427_p6 = scmp.lt.u32.totalorder %s423_s13, %s518_s3 }
 0x1d8   :  { %p429_p7 = pnand %p427_p6, %p424_p5 }
 0x1da   :  { %432 = shalt.err (!%p429_p7)
}
 0x1db   :  { %s438_s18 = smov 128   ;;  %s439_s19 = smov 8  }
 0x1dc   :  { %335 = dma.vmem_to_hbm [thread:$0]  %s330_s10, 256, %s518_s3, [#allocation3], %s438_s18, %s438_s18, %s439_s19  }
 0x1dd   :  { %433 = dma.done.wait [#allocation3], 256  }
 0x1de   :  { %434 = vsyncadd [#allocation3], 4294967040 }
 0x1df   :  { %339 = vsyncpa [#allocation3], 1 }

</bundles_post_ra>
